<compile_context>
chip_gen: v5e
topology: v5e:2x2
jax: 0.10.0
libtpu: 0.0.40
codegen_flags: <defaults>
</compile_context>

<pallas_src>
import functools

import jax
import jax.numpy as jnp
from jax.experimental import pallas as pl
from jax.experimental.pallas import tpu as pltpu


def lstm_net_kernel(x2d_ref,      # (T*B, D)   f32, row index = t*B + b (time-major)
                    wih_ref,      # (D, 4H)    f32, gate cols (i,f,o,g); i/f/o pre-scaled by 1/2
                    whh_ref,      # (H, 4H)    f32, gate cols (i,f,o,g); i/f/o pre-scaled by 1/2
                    bias_ref,     # (1, 4H)    f32, b_ih + b_hh, same order/scaling
                    w1_ref,       # (H, H//2)  f32  (transposed fc1 weight)
                    b1_ref,       # (1, H//2)  f32
                    w2_ref,       # (H//2, O)  f32  (transposed fc2 weight)
                    b2_ref,       # (1, O)     f32
                    out_ref,      # (B, O)     f32
                    *, batch, hidden_dim, seq_len):
    B, H, T = batch, hidden_dim, seq_len

    # --- Prologue: one MXU matmul covering every timestep's input projection,
    # with both LSTM biases folded in.  (T*B, 4H) = 2 vregs at the demo sizes, so
    # it stays a value (no VMEM scratch round-trips in the recurrence).
    xproj = (jnp.dot(x2d_ref[...], wih_ref[...],
                     preferred_element_type=jnp.float32)
             + bias_ref[...])

    whh = whh_ref[...]   # hoisted once; 4 vregs at H=32 (re-read per step if H grows)

    def cell(pre, c_prev):
        # One EUP launch for all gates: pre-activation columns for i/f/o were
        # pre-scaled by 1/2, so sigmoid(z) == 0.5 * tanh(pre) + 0.5 for those
        # columns, while the g column stays a plain tanh.
        t_all = jnp.tanh(pre)                 # (B, 4H)  - single full-width tanh
        s_all = 0.5 * t_all + 0.5             # full-width VPU FMA
        i_g = s_all[:, 0 * H:1 * H]           # static 32-lane extracts, once per gate
        f_g = s_all[:, 1 * H:2 * H]
        o_g = s_all[:, 2 * H:3 * H]
        g_g = t_all[:, 3 * H:4 * H]
        if c_prev is None:                    # t == 0: c_{-1} == 0
            c_new = i_g * g_g
        else:
            c_new = f_g * c_prev + i_g * g_g
        h_new = o_g * jnp.tanh(c_new)
        return h_new, c_new

    # --- t = 0 peeled: h0 = c0 = 0  =>  gates = xproj[0:B]  (no h @ W_hh matmul).
    h, c = cell(xproj[0:B, :], None)

    # --- Recurrence t = 1 .. T-1, fully unrolled; all slice offsets are static,
    # h / c live in vregs as Python-loop carries.
    for t in range(1, T):
        pre = xproj[t * B:(t + 1) * B, :] + jnp.dot(
            h, whh, preferred_element_type=jnp.float32)
        h, c = cell(pre, c)

    # --- Head: out = fc2(relu(fc1(h_T)))
    hid = jnp.maximum(
        jnp.dot(h, w1_ref[...], preferred_element_type=jnp.float32) + b1_ref[...],
        0.0)
    out = jnp.dot(hid, w2_ref[...], preferred_element_type=jnp.float32) + b2_ref[...]
    out_ref[...] = out.astype(out_ref.dtype)


def lstm_net_forward(x, params, hidden_dim):
    """x: (batch, seq, input_dim) float32 (PyTorch batch_first layout)."""
    B, T, D = x.shape
    H = hidden_dim
    O = params["w2"].shape[0]

    def prep_gates(w, axis=0):
        # PyTorch gate order (i, f, g, o) -> (i, f, o, g), and fold the 1/2 of the
        # sigmoid-via-tanh identity into the i/f/o blocks (g stays unscaled).
        i, f, g, o = jnp.split(w, 4, axis=axis)
        return jnp.concatenate([0.5 * i, 0.5 * f, 0.5 * o, g], axis=axis)

    # Plain-JAX data prep (glue, off the critical path):
    #   * time-major flattened x (row index t*B + b) -> one prologue matmul
    #   * gate reorder + 1/2-scale; both LSTM biases pre-summed
    #   * all weights pre-transposed to (in_features, out_features)
    x2d = jnp.transpose(x, (1, 0, 2)).reshape(T * B, D)              # (T*B, D)
    wih_t = prep_gates(params["w_ih"]).T                             # (D, 4H)
    whh_t = prep_gates(params["w_hh"]).T                             # (H, 4H)
    bias = prep_gates(params["b_ih"] + params["b_hh"]).reshape(1, 4 * H)
    w1_t = params["w1"].T                                            # (H, H//2)
    b1 = params["b1"].reshape(1, H // 2)
    w2_t = params["w2"].T                                            # (H//2, O)
    b2 = params["b2"].reshape(1, O)

    vmem = pl.BlockSpec(memory_space=pltpu.MemorySpace.VMEM)
    kernel = functools.partial(lstm_net_kernel, batch=B, hidden_dim=H, seq_len=T)
    # TODO(synk): at production sizes, add a batch-chunk grid with
    # dimension_semantics=("parallel",) (v7x dual TensorCore) and T-chunked
    # pipelined BlockSpecs / vmem_limit_bytes; at B=2, T=8 a single grid-less
    # invocation is optimal.
    return pl.pallas_call(
        kernel,
        out_shape=jax.ShapeDtypeStruct((B, O), jnp.float32),
        in_specs=[vmem] * 8,
        out_specs=vmem,
    )(x2d, wih_t, whh_t, bias, w1_t, b1, w2_t, b2)


def init_params(key, input_dim, hidden_dim, output_dim):
    """Deterministic synthetic parameters with PyTorch-consistent shapes."""
    H = hidden_dim
    ks = jax.random.split(key, 8)
    scale = 0.1
    return {
        "w_ih": scale * jax.random.normal(ks[0], (4 * H, input_dim), jnp.float32),
        "w_hh": scale * jax.random.normal(ks[1], (4 * H, H), jnp.float32),
        "b_ih": scale * jax.random.normal(ks[2], (4 * H,), jnp.float32),
        "b_hh": scale * jax.random.normal(ks[3], (4 * H,), jnp.float32),
        "w1":   scale * jax.random.normal(ks[4], (H // 2, H), jnp.float32),
        "b1":   scale * jax.random.normal(ks[5], (H // 2,), jnp.float32),
        "w2":   scale * jax.random.normal(ks[6], (output_dim, H // 2), jnp.float32),
        "b2":   scale * jax.random.normal(ks[7], (output_dim,), jnp.float32),
    }


def reference_forward(x, params, hidden_dim):
    """Pure-JAX reference matching nn.LSTM + fc head semantics (PyTorch gate order)."""
    B, T, D = x.shape
    H = hidden_dim
    h = jnp.zeros((B, H), jnp.float32)
    c = jnp.zeros((B, H), jnp.float32)
    for t in range(T):
        gates = (x[:, t, :] @ params["w_ih"].T + params["b_ih"]
                 + h @ params["w_hh"].T + params["b_hh"])
        i = jax.nn.sigmoid(gates[:, 0 * H:1 * H])
        f = jax.nn.sigmoid(gates[:, 1 * H:2 * H])
        g = jnp.tanh(gates[:, 2 * H:3 * H])
        o = jax.nn.sigmoid(gates[:, 3 * H:4 * H])
        c = f * c + i * g
        h = o * jnp.tanh(c)
    hid = jnp.maximum(h @ params["w1"].T + params["b1"], 0.0)
    return hid @ params["w2"].T + params["b2"]


if __name__ == "__main__":
    batch, seq, input_dim, hidden_dim, output_dim = 2, 8, 4, 32, 4

    key = jax.random.PRNGKey(0)
    k_x, k_p = jax.random.split(key)
    x = jax.random.normal(k_x, (batch, seq, input_dim), jnp.float32)
    params = init_params(k_p, input_dim, hidden_dim, output_dim)

    out = lstm_net_forward(x, params, hidden_dim)
    out = jax.block_until_ready(out)

    ref = reference_forward(x, params, hidden_dim)
    assert out.shape == (batch, output_dim)
    # Tolerance covers the (exact-in-math) sigmoid-via-tanh identity's ~ulp-level
    # EUP approximation differences and default MXU f32 matmul precision.
    assert jnp.allclose(out, ref, atol=1e-4, rtol=1e-4), (out, ref)

    print("KERNEL_OK")
</pallas_src>

<mosaic_0001>
module attributes {stable_mosaic.version = 11 : i64} {
  func.func @lstm_net_kernel(%arg0: memref<16x4xf32, #tpu.memory_space<vmem>>, %arg1: memref<4x128xf32, #tpu.memory_space<vmem>>, %arg2: memref<32x128xf32, #tpu.memory_space<vmem>>, %arg3: memref<1x128xf32, #tpu.memory_space<vmem>>, %arg4: memref<32x16xf32, #tpu.memory_space<vmem>>, %arg5: memref<1x16xf32, #tpu.memory_space<vmem>>, %arg6: memref<16x4xf32, #tpu.memory_space<vmem>>, %arg7: memref<1x4xf32, #tpu.memory_space<vmem>>, %arg8: memref<2x4xf32, #tpu.memory_space<vmem>>) attributes {dimension_semantics = [], scalar_prefetch = 0 : i64, scratch_operands = 0 : i64, tpu.core_type = #tpu.core_type<tc>} {
    %c0 = arith.constant 0 : index
    %c0_0 = arith.constant 0 : index
    %0 = vector.load %arg0[%c0, %c0_0] : memref<16x4xf32, #tpu.memory_space<vmem>>, vector<16x4xf32>
    %c0_1 = arith.constant 0 : index
    %c0_2 = arith.constant 0 : index
    %1 = vector.load %arg1[%c0_1, %c0_2] : memref<4x128xf32, #tpu.memory_space<vmem>>, vector<4x128xf32>
    %cst = arith.constant dense<0.000000e+00> : vector<16x128xf32>
    %2 = tpu.matmul %0, %1, %cst {dimension_numbers = #tpu.dot_dimension_numbers<[1], [0], [0], [1], [0, 0, 1, 1], [], []>} : vector<16x4xf32>, vector<4x128xf32>, vector<16x128xf32> -> vector<16x128xf32>
    %c0_3 = arith.constant 0 : index
    %c0_4 = arith.constant 0 : index
    %3 = vector.load %arg3[%c0_3, %c0_4] : memref<1x128xf32, #tpu.memory_space<vmem>>, vector<1x128xf32>
    %4 = vector.broadcast %3 : vector<1x128xf32> to vector<16x128xf32>
    %5 = arith.addf %2, %4 : vector<16x128xf32>
    %c0_5 = arith.constant 0 : index
    %c0_6 = arith.constant 0 : index
    %6 = vector.load %arg2[%c0_5, %c0_6] : memref<32x128xf32, #tpu.memory_space<vmem>>, vector<32x128xf32>
    %7 = vector.extract_strided_slice %5 {offsets = [0, 0], sizes = [2, 128], strides = [1, 1]} : vector<16x128xf32> to vector<2x128xf32>
    %8 = math.tanh %7 : vector<2x128xf32>
    %cst_7 = arith.constant 5.000000e-01 : f32
    %9 = vector.broadcast %cst_7 : f32 to vector<2x128xf32>
    %10 = arith.mulf %9, %8 : vector<2x128xf32>
    %cst_8 = arith.constant 5.000000e-01 : f32
    %11 = vector.broadcast %cst_8 : f32 to vector<2x128xf32>
    %12 = arith.addf %10, %11 : vector<2x128xf32>
    %13 = vector.extract_strided_slice %12 {offsets = [0, 0], sizes = [2, 32], strides = [1, 1]} : vector<2x128xf32> to vector<2x32xf32>
    %14 = vector.extract_strided_slice %12 {offsets = [0, 64], sizes = [2, 32], strides = [1, 1]} : vector<2x128xf32> to vector<2x32xf32>
    %15 = vector.extract_strided_slice %8 {offsets = [0, 96], sizes = [2, 32], strides = [1, 1]} : vector<2x128xf32> to vector<2x32xf32>
    %16 = arith.mulf %13, %15 : vector<2x32xf32>
    %17 = math.tanh %16 : vector<2x32xf32>
    %18 = arith.mulf %14, %17 : vector<2x32xf32>
    %19 = vector.extract_strided_slice %5 {offsets = [2, 0], sizes = [2, 128], strides = [1, 1]} : vector<16x128xf32> to vector<2x128xf32>
    %cst_9 = arith.constant dense<0.000000e+00> : vector<2x128xf32>
    %20 = tpu.matmul %18, %6, %cst_9 {dimension_numbers = #tpu.dot_dimension_numbers<[1], [0], [0], [1], [0, 0, 1, 1], [], []>} : vector<2x32xf32>, vector<32x128xf32>, vector<2x128xf32> -> vector<2x128xf32>
    %21 = arith.addf %19, %20 : vector<2x128xf32>
    %22 = math.tanh %21 : vector<2x128xf32>
    %cst_10 = arith.constant 5.000000e-01 : f32
    %23 = vector.broadcast %cst_10 : f32 to vector<2x128xf32>
    %24 = arith.mulf %23, %22 : vector<2x128xf32>
    %cst_11 = arith.constant 5.000000e-01 : f32
    %25 = vector.broadcast %cst_11 : f32 to vector<2x128xf32>
    %26 = arith.addf %24, %25 : vector<2x128xf32>
    %27 = vector.extract_strided_slice %26 {offsets = [0, 0], sizes = [2, 32], strides = [1, 1]} : vector<2x128xf32> to vector<2x32xf32>
    %28 = vector.extract_strided_slice %26 {offsets = [0, 32], sizes = [2, 32], strides = [1, 1]} : vector<2x128xf32> to vector<2x32xf32>
    %29 = vector.extract_strided_slice %26 {offsets = [0, 64], sizes = [2, 32], strides = [1, 1]} : vector<2x128xf32> to vector<2x32xf32>
    %30 = vector.extract_strided_slice %22 {offsets = [0, 96], sizes = [2, 32], strides = [1, 1]} : vector<2x128xf32> to vector<2x32xf32>
    %31 = arith.mulf %28, %16 : vector<2x32xf32>
    %32 = arith.mulf %27, %30 : vector<2x32xf32>
    %33 = arith.addf %31, %32 : vector<2x32xf32>
    %34 = math.tanh %33 : vector<2x32xf32>
    %35 = arith.mulf %29, %34 : vector<2x32xf32>
    %36 = vector.extract_strided_slice %5 {offsets = [4, 0], sizes = [2, 128], strides = [1, 1]} : vector<16x128xf32> to vector<2x128xf32>
    %cst_12 = arith.constant dense<0.000000e+00> : vector<2x128xf32>
    %37 = tpu.matmul %35, %6, %cst_12 {dimension_numbers = #tpu.dot_dimension_numbers<[1], [0], [0], [1], [0, 0, 1, 1], [], []>} : vector<2x32xf32>, vector<32x128xf32>, vector<2x128xf32> -> vector<2x128xf32>
    %38 = arith.addf %36, %37 : vector<2x128xf32>
    %39 = math.tanh %38 : vector<2x128xf32>
    %cst_13 = arith.constant 5.000000e-01 : f32
    %40 = vector.broadcast %cst_13 : f32 to vector<2x128xf32>
    %41 = arith.mulf %40, %39 : vector<2x128xf32>
    %cst_14 = arith.constant 5.000000e-01 : f32
    %42 = vector.broadcast %cst_14 : f32 to vector<2x128xf32>
    %43 = arith.addf %41, %42 : vector<2x128xf32>
    %44 = vector.extract_strided_slice %43 {offsets = [0, 0], sizes = [2, 32], strides = [1, 1]} : vector<2x128xf32> to vector<2x32xf32>
    %45 = vector.extract_strided_slice %43 {offsets = [0, 32], sizes = [2, 32], strides = [1, 1]} : vector<2x128xf32> to vector<2x32xf32>
    %46 = vector.extract_strided_slice %43 {offsets = [0, 64], sizes = [2, 32], strides = [1, 1]} : vector<2x128xf32> to vector<2x32xf32>
    %47 = vector.extract_strided_slice %39 {offsets = [0, 96], sizes = [2, 32], strides = [1, 1]} : vector<2x128xf32> to vector<2x32xf32>
    %48 = arith.mulf %45, %33 : vector<2x32xf32>
    %49 = arith.mulf %44, %47 : vector<2x32xf32>
    %50 = arith.addf %48, %49 : vector<2x32xf32>
    %51 = math.tanh %50 : vector<2x32xf32>
    %52 = arith.mulf %46, %51 : vector<2x32xf32>
    %53 = vector.extract_strided_slice %5 {offsets = [6, 0], sizes = [2, 128], strides = [1, 1]} : vector<16x128xf32> to vector<2x128xf32>
    %cst_15 = arith.constant dense<0.000000e+00> : vector<2x128xf32>
    %54 = tpu.matmul %52, %6, %cst_15 {dimension_numbers = #tpu.dot_dimension_numbers<[1], [0], [0], [1], [0, 0, 1, 1], [], []>} : vector<2x32xf32>, vector<32x128xf32>, vector<2x128xf32> -> vector<2x128xf32>
    %55 = arith.addf %53, %54 : vector<2x128xf32>
    %56 = math.tanh %55 : vector<2x128xf32>
    %cst_16 = arith.constant 5.000000e-01 : f32
    %57 = vector.broadcast %cst_16 : f32 to vector<2x128xf32>
    %58 = arith.mulf %57, %56 : vector<2x128xf32>
    %cst_17 = arith.constant 5.000000e-01 : f32
    %59 = vector.broadcast %cst_17 : f32 to vector<2x128xf32>
    %60 = arith.addf %58, %59 : vector<2x128xf32>
    %61 = vector.extract_strided_slice %60 {offsets = [0, 0], sizes = [2, 32], strides = [1, 1]} : vector<2x128xf32> to vector<2x32xf32>
    %62 = vector.extract_strided_slice %60 {offsets = [0, 32], sizes = [2, 32], strides = [1, 1]} : vector<2x128xf32> to vector<2x32xf32>
    %63 = vector.extract_strided_slice %60 {offsets = [0, 64], sizes = [2, 32], strides = [1, 1]} : vector<2x128xf32> to vector<2x32xf32>
    %64 = vector.extract_strided_slice %56 {offsets = [0, 96], sizes = [2, 32], strides = [1, 1]} : vector<2x128xf32> to vector<2x32xf32>
    %65 = arith.mulf %62, %50 : vector<2x32xf32>
    %66 = arith.mulf %61, %64 : vector<2x32xf32>
    %67 = arith.addf %65, %66 : vector<2x32xf32>
    %68 = math.tanh %67 : vector<2x32xf32>
    %69 = arith.mulf %63, %68 : vector<2x32xf32>
    %70 = vector.extract_strided_slice %5 {offsets = [8, 0], sizes = [2, 128], strides = [1, 1]} : vector<16x128xf32> to vector<2x128xf32>
    %cst_18 = arith.constant dense<0.000000e+00> : vector<2x128xf32>
    %71 = tpu.matmul %69, %6, %cst_18 {dimension_numbers = #tpu.dot_dimension_numbers<[1], [0], [0], [1], [0, 0, 1, 1], [], []>} : vector<2x32xf32>, vector<32x128xf32>, vector<2x128xf32> -> vector<2x128xf32>
    %72 = arith.addf %70, %71 : vector<2x128xf32>
    %73 = math.tanh %72 : vector<2x128xf32>
    %cst_19 = arith.constant 5.000000e-01 : f32
    %74 = vector.broadcast %cst_19 : f32 to vector<2x128xf32>
    %75 = arith.mulf %74, %73 : vector<2x128xf32>
    %cst_20 = arith.constant 5.000000e-01 : f32
    %76 = vector.broadcast %cst_20 : f32 to vector<2x128xf32>
    %77 = arith.addf %75, %76 : vector<2x128xf32>
    %78 = vector.extract_strided_slice %77 {offsets = [0, 0], sizes = [2, 32], strides = [1, 1]} : vector<2x128xf32> to vector<2x32xf32>
    %79 = vector.extract_strided_slice %77 {offsets = [0, 32], sizes = [2, 32], strides = [1, 1]} : vector<2x128xf32> to vector<2x32xf32>
    %80 = vector.extract_strided_slice %77 {offsets = [0, 64], sizes = [2, 32], strides = [1, 1]} : vector<2x128xf32> to vector<2x32xf32>
    %81 = vector.extract_strided_slice %73 {offsets = [0, 96], sizes = [2, 32], strides = [1, 1]} : vector<2x128xf32> to vector<2x32xf32>
    %82 = arith.mulf %79, %67 : vector<2x32xf32>
    %83 = arith.mulf %78, %81 : vector<2x32xf32>
    %84 = arith.addf %82, %83 : vector<2x32xf32>
    %85 = math.tanh %84 : vector<2x32xf32>
    %86 = arith.mulf %80, %85 : vector<2x32xf32>
    %87 = vector.extract_strided_slice %5 {offsets = [10, 0], sizes = [2, 128], strides = [1, 1]} : vector<16x128xf32> to vector<2x128xf32>
    %cst_21 = arith.constant dense<0.000000e+00> : vector<2x128xf32>
    %88 = tpu.matmul %86, %6, %cst_21 {dimension_numbers = #tpu.dot_dimension_numbers<[1], [0], [0], [1], [0, 0, 1, 1], [], []>} : vector<2x32xf32>, vector<32x128xf32>, vector<2x128xf32> -> vector<2x128xf32>
    %89 = arith.addf %87, %88 : vector<2x128xf32>
    %90 = math.tanh %89 : vector<2x128xf32>
    %cst_22 = arith.constant 5.000000e-01 : f32
    %91 = vector.broadcast %cst_22 : f32 to vector<2x128xf32>
    %92 = arith.mulf %91, %90 : vector<2x128xf32>
    %cst_23 = arith.constant 5.000000e-01 : f32
    %93 = vector.broadcast %cst_23 : f32 to vector<2x128xf32>
    %94 = arith.addf %92, %93 : vector<2x128xf32>
    %95 = vector.extract_strided_slice %94 {offsets = [0, 0], sizes = [2, 32], strides = [1, 1]} : vector<2x128xf32> to vector<2x32xf32>
    %96 = vector.extract_strided_slice %94 {offsets = [0, 32], sizes = [2, 32], strides = [1, 1]} : vector<2x128xf32> to vector<2x32xf32>
    %97 = vector.extract_strided_slice %94 {offsets = [0, 64], sizes = [2, 32], strides = [1, 1]} : vector<2x128xf32> to vector<2x32xf32>
    %98 = vector.extract_strided_slice %90 {offsets = [0, 96], sizes = [2, 32], strides = [1, 1]} : vector<2x128xf32> to vector<2x32xf32>
    %99 = arith.mulf %96, %84 : vector<2x32xf32>
    %100 = arith.mulf %95, %98 : vector<2x32xf32>
    %101 = arith.addf %99, %100 : vector<2x32xf32>
    %102 = math.tanh %101 : vector<2x32xf32>
    %103 = arith.mulf %97, %102 : vector<2x32xf32>
    %104 = vector.extract_strided_slice %5 {offsets = [12, 0], sizes = [2, 128], strides = [1, 1]} : vector<16x128xf32> to vector<2x128xf32>
    %cst_24 = arith.constant dense<0.000000e+00> : vector<2x128xf32>
    %105 = tpu.matmul %103, %6, %cst_24 {dimension_numbers = #tpu.dot_dimension_numbers<[1], [0], [0], [1], [0, 0, 1, 1], [], []>} : vector<2x32xf32>, vector<32x128xf32>, vector<2x128xf32> -> vector<2x128xf32>
    %106 = arith.addf %104, %105 : vector<2x128xf32>
    %107 = math.tanh %106 : vector<2x128xf32>
    %cst_25 = arith.constant 5.000000e-01 : f32
    %108 = vector.broadcast %cst_25 : f32 to vector<2x128xf32>
    %109 = arith.mulf %108, %107 : vector<2x128xf32>
    %cst_26 = arith.constant 5.000000e-01 : f32
    %110 = vector.broadcast %cst_26 : f32 to vector<2x128xf32>
    %111 = arith.addf %109, %110 : vector<2x128xf32>
    %112 = vector.extract_strided_slice %111 {offsets = [0, 0], sizes = [2, 32], strides = [1, 1]} : vector<2x128xf32> to vector<2x32xf32>
    %113 = vector.extract_strided_slice %111 {offsets = [0, 32], sizes = [2, 32], strides = [1, 1]} : vector<2x128xf32> to vector<2x32xf32>
    %114 = vector.extract_strided_slice %111 {offsets = [0, 64], sizes = [2, 32], strides = [1, 1]} : vector<2x128xf32> to vector<2x32xf32>
    %115 = vector.extract_strided_slice %107 {offsets = [0, 96], sizes = [2, 32], strides = [1, 1]} : vector<2x128xf32> to vector<2x32xf32>
    %116 = arith.mulf %113, %101 : vector<2x32xf32>
    %117 = arith.mulf %112, %115 : vector<2x32xf32>
    %118 = arith.addf %116, %117 : vector<2x32xf32>
    %119 = math.tanh %118 : vector<2x32xf32>
    %120 = arith.mulf %114, %119 : vector<2x32xf32>
    %121 = vector.extract_strided_slice %5 {offsets = [14, 0], sizes = [2, 128], strides = [1, 1]} : vector<16x128xf32> to vector<2x128xf32>
    %cst_27 = arith.constant dense<0.000000e+00> : vector<2x128xf32>
    %122 = tpu.matmul %120, %6, %cst_27 {dimension_numbers = #tpu.dot_dimension_numbers<[1], [0], [0], [1], [0, 0, 1, 1], [], []>} : vector<2x32xf32>, vector<32x128xf32>, vector<2x128xf32> -> vector<2x128xf32>
    %123 = arith.addf %121, %122 : vector<2x128xf32>
    %124 = math.tanh %123 : vector<2x128xf32>
    %cst_28 = arith.constant 5.000000e-01 : f32
    %125 = vector.broadcast %cst_28 : f32 to vector<2x128xf32>
    %126 = arith.mulf %125, %124 : vector<2x128xf32>
    %cst_29 = arith.constant 5.000000e-01 : f32
    %127 = vector.broadcast %cst_29 : f32 to vector<2x128xf32>
    %128 = arith.addf %126, %127 : vector<2x128xf32>
    %129 = vector.extract_strided_slice %128 {offsets = [0, 0], sizes = [2, 32], strides = [1, 1]} : vector<2x128xf32> to vector<2x32xf32>
    %130 = vector.extract_strided_slice %128 {offsets = [0, 32], sizes = [2, 32], strides = [1, 1]} : vector<2x128xf32> to vector<2x32xf32>
    %131 = vector.extract_strided_slice %128 {offsets = [0, 64], sizes = [2, 32], strides = [1, 1]} : vector<2x128xf32> to vector<2x32xf32>
    %132 = vector.extract_strided_slice %124 {offsets = [0, 96], sizes = [2, 32], strides = [1, 1]} : vector<2x128xf32> to vector<2x32xf32>
    %133 = arith.mulf %130, %118 : vector<2x32xf32>
    %134 = arith.mulf %129, %132 : vector<2x32xf32>
    %135 = arith.addf %133, %134 : vector<2x32xf32>
    %136 = math.tanh %135 : vector<2x32xf32>
    %137 = arith.mulf %131, %136 : vector<2x32xf32>
    %c0_30 = arith.constant 0 : index
    %c0_31 = arith.constant 0 : index
    %138 = vector.load %arg4[%c0_30, %c0_31] : memref<32x16xf32, #tpu.memory_space<vmem>>, vector<32x16xf32>
    %cst_32 = arith.constant dense<0.000000e+00> : vector<2x16xf32>
    %139 = tpu.matmul %137, %138, %cst_32 {dimension_numbers = #tpu.dot_dimension_numbers<[1], [0], [0], [1], [0, 0, 1, 1], [], []>} : vector<2x32xf32>, vector<32x16xf32>, vector<2x16xf32> -> vector<2x16xf32>
    %c0_33 = arith.constant 0 : index
    %c0_34 = arith.constant 0 : index
    %140 = vector.load %arg5[%c0_33, %c0_34] : memref<1x16xf32, #tpu.memory_space<vmem>>, vector<1x16xf32>
    %141 = vector.broadcast %140 : vector<1x16xf32> to vector<2x16xf32>
    %142 = arith.addf %139, %141 : vector<2x16xf32>
    %cst_35 = arith.constant 0.000000e+00 : f32
    %143 = vector.broadcast %cst_35 : f32 to vector<2x16xf32>
    %144 = arith.maximumf %142, %143 : vector<2x16xf32>
    %c0_36 = arith.constant 0 : index
    %c0_37 = arith.constant 0 : index
    %145 = vector.load %arg6[%c0_36, %c0_37] : memref<16x4xf32, #tpu.memory_space<vmem>>, vector<16x4xf32>
    %cst_38 = arith.constant dense<0.000000e+00> : vector<2x4xf32>
    %146 = tpu.matmul %144, %145, %cst_38 {dimension_numbers = #tpu.dot_dimension_numbers<[1], [0], [0], [1], [0, 0, 1, 1], [], []>} : vector<2x16xf32>, vector<16x4xf32>, vector<2x4xf32> -> vector<2x4xf32>
    %c0_39 = arith.constant 0 : index
    %c0_40 = arith.constant 0 : index
    %147 = vector.load %arg7[%c0_39, %c0_40] : memref<1x4xf32, #tpu.memory_space<vmem>>, vector<1x4xf32>
    %148 = vector.broadcast %147 : vector<1x4xf32> to vector<2x4xf32>
    %149 = arith.addf %146, %148 : vector<2x4xf32>
    %c0_41 = arith.constant 0 : index
    %c0_42 = arith.constant 0 : index
    %150 = vector.load %arg8[%c0_41, %c0_42] : memref<2x4xf32, #tpu.memory_space<vmem>>, vector<2x4xf32>
    tpu.vector_store %arg8[%c0_41, %c0_42], %149 {strides = array<i32>} : memref<2x4xf32, #tpu.memory_space<vmem>>, vector<2x4xf32>,
    return
  }
}

</mosaic_0001>

<bundles_post_ra>
// kernel: tpu_custom_call.1
= control target key start
LH: loop header
LB: loop body
LE: loop exit
PB: predicated region body
PF: predicated region fallthrough
CT: control target
= control target key end

     0   :  { %vm44_vm0 = vcmask 1043456   ;;  %vm37_vm1 = vcmask 31744   ;;  %s774_s0 = inlined_call_operand.vmem [shape: f32[16,4], index: 0, kind: input, shape index: {}]   ;;  %s775_s1 = inlined_call_operand.vmem [shape: f32[4,128], index: 1, kind: input, shape index: {}]   ;;  %s776_s2 = inlined_call_operand.vmem [shape: f32[32,128], index: 2, kind: input, shape index: {}]   ;;  %s777_s3 = inlined_call_operand.vmem [shape: f32[1,128], index: 3, kind: input, shape index: {}]   ;;  %s778_s4 = inlined_call_operand.vmem [shape: f32[32,16], index: 4, kind: input, shape index: {}]   ;;  %s779_s5 = inlined_call_operand.vmem [shape: f32[1,16], index: 5, kind: input, shape index: {}]   ;;  %s780_s6 = inlined_call_operand.vmem [shape: f32[16,4], index: 6, kind: input, shape index: {}]   ;;  %s781_s7 = inlined_call_operand.vmem [shape: f32[1,4], index: 7, kind: input, shape index: {}]   ;;  %s782_s8 = inlined_call_operand.hbm [shape: f32[2,4], index: 8, kind: output, shape index: {}]  }
   0x1   :  { %v32_v0 = vld [vmem:[%s775_s1] sm:$0xf] }
   0x2   :  { %v30_v1 = vld [vmem:[%s774_s0] sm:$0xff]  ;;  %541 = vmatpush.msk.msra.mxu0 %vm44_vm0, %v32_v0 }
   0x3   :  { %542 = vmatmul.msk.f32.vlgmr.msra.gmra.mxu0 %vm37_vm1, %v30_v1 }
   0x4   :  { %13 = vsyncpa [#allocation3], 0  ;;  %v675_v2 = vld [vmem:[%s777_s3] ss:$0 sm:$0xff]  ;;  %s617_s1 = smov 32   ;;  %s618_s3 = smov 64  }
   0x5   :  { %v74_v12 = vld [vmem:[%s776_s2 + $0x18] sm:$0xff]  ;;  %v73_v13 = vld [vmem:[%s776_s2 + $0x10] sm:$0xff]  ;;  %v72_v14 = vld [vmem:[%s776_s2 + $0x8] sm:$0xff]  ;;  %vm92_vm2 = vcmask 261120   ;;  %vm499_vm3 = vcmask 130048   ;;  %vm523_vm4 = vcmask 25600  }
   0x6   :  { %107 = vmatpush.msra.mxu1 %v74_v12  ;;  %162 = vmatpush.msra.mxu2 %v74_v12  ;;  %v71_v15 = vld [vmem:[%s776_s2] sm:$0xff] }
   0x7   :  { %215 = vmatpush.msra.mxu3 %v74_v12  ;;  %423 = vmatpush.msrb.mxu0 %v74_v12 }
   0x8   :  { %108 = vmatpush.msra.mxu1 %v73_v13  ;;  %163 = vmatpush.msra.mxu2 %v73_v13 }
   0x9   :  { %216 = vmatpush.msra.mxu3 %v73_v13  ;;  %424 = vmatpush.msrb.mxu0 %v73_v13 }
   0xa   :  { %109 = vmatpush.msra.mxu1 %v72_v14  ;;  %164 = vmatpush.msra.mxu2 %v72_v14 }
   0xb   :  { %217 = vmatpush.msra.mxu3 %v72_v14  ;;  %425 = vmatpush.msrb.mxu0 %v72_v14 }
   0xc   :  { %110 = vmatpush.msra.mxu1 %v71_v15  ;;  %165 = vmatpush.msra.mxu2 %v71_v15 }
   0xd   :  { %218 = vmatpush.msra.mxu3 %v71_v15  ;;  %426 = vmatpush.msrb.mxu0 %v71_v15 }
   0xe   :  { %268 = vmatpush.msrb.mxu1 %v74_v12  ;;  %317 = vmatpush.msrb.mxu2 %v74_v12 }
   0xf   :  { %370 = vmatpush.msrb.mxu3 %v74_v12 }
  0x10   :  { %269 = vmatpush.msrb.mxu1 %v73_v13  ;;  %318 = vmatpush.msrb.mxu2 %v73_v13 }
  0x11   :  { %371 = vmatpush.msrb.mxu3 %v73_v13 }
  0x12   :  { %270 = vmatpush.msrb.mxu1 %v72_v14  ;;  %319 = vmatpush.msrb.mxu2 %v72_v14 }
  0x13   :  { %372 = vmatpush.msrb.mxu3 %v72_v14 }
  0x14   :  { %271 = vmatpush.msrb.mxu1 %v71_v15  ;;  %320 = vmatpush.msrb.mxu2 %v71_v15 }
  0x15   :  { %373 = vmatpush.msrb.mxu3 %v71_v15 }
  0x80   :  { %v65_v3 = vpop.f32.mrf.mxu0 }
  0x81   :  { %v678_v4 = vadd.f32 %v675_v2, %v65_v3  ;;  %v31_v3 = vld [vmem:[%s774_s0 + $0x8] sm:$0xff] }
  0x82   :  { %543 = vmatmul.msk.f32.gmra.mxu0 %vm37_vm1, %v31_v3 }
  0x83   :  { %559 = vtanh.f32 %v678_v4 }
  0x89   :  { %v560_v5 = vpop.eup %559 }
  0x8a   :  { %79 = vrot.lane.b32.xlu0 %v560_v5, %s617_s1  ;;  %v76_v6 = vmul.f32 0.5, %v560_v5 }
  0x8c   :  { %v77_v7 = vadd.f32 0.5, %v76_v6 }
  0xfc   :  { %v80_v8 = vpop.permute.xlu0 %79 }
  0xfd   :  { %v82_v9 = vmul.f32 %v80_v8, %v77_v7 }
  0xff   :  { %561 = vtanh.f32 %v82_v9  ;;  %v123_v10 = vrot.slane %v82_v9, 6  ;;  %v68_v8 = vpop.f32.mrf.mxu0 }
 0x100   :  { %v721_v9 = vadd.f32 %v675_v2, %v68_v8  ;;  %v461_v8 = vld [vmem:[%s778_s4 + $0x18] sm:$0xff] }
 0x101   :  { %124 = vrot.lane.b32.xlu2 %v123_v10, %s617_s1 }
 0x105   :  { %v562_v11 = vpop.eup %561 }
 0x106   :  { %85 = vrot.lane.b32.xlu0 %v562_v11, %s618_s3 }
 0x15b   :  { %v125_v27 = vpop.permute.xlu2 %124 }
 0x178   :  { %v86_v16 = vpop.permute.xlu0 %85 }
 0x179   :  { %v88_v17 = vmul.f32 %v86_v16, %v77_v7 }
 0x17b   :  { %90 = vrot.lane.b32.xlu1 %v88_v17, %s618_s3 }
 0x1ed   :  { %v91_v18 = vpop.permute.xlu1 %90 }
 0x1ee   :  { %544 = vmatmul.msk.f32.vlgmr.msra.gmra.mxu1 %vm92_vm2, %v91_v18 }
 0x1ef   :  { %484 = vmatpush.msra.mxu1 %v461_v8 }
 0x26b   :  { %v112_v19 = vpop.f32.mrf.mxu1 }
 0x26c   :  { %v116_v20 = vrot.slane %v112_v19, 6 }
 0x26e   :  { %v118_v21 = vadd.f32 %v116_v20, %v678_v4 }
 0x270   :  { %563 = vtanh.f32 %v118_v21 }
 0x276   :  { %v564_v22 = vpop.eup %563 }
 0x277   :  { %129 = vrot.lane.b32.xlu1 %v564_v22, %s617_s1  ;;  %v120_v23 = vmul.f32 0.5, %v564_v22 }
 0x279   :  { %v121_v24 = vadd.f32 0.5, %v120_v23 }
 0x27b   :  { %v127_v28 = vmul.f32 %v125_v27, %v121_v24 }
 0x2e9   :  { %v130_v25 = vpop.permute.xlu1 %129 }
 0x2ea   :  { %v132_v26 = vmul.f32 %v130_v25, %v121_v24 }
 0x2ec   :  { %134 = vrot.lane.b32.xlu2 %v132_v26, %s617_s1 }
 0x346   :  { %v135_v29 = vpop.permute.xlu2 %134 }
 0x347   :  { %v137_v30 = vadd.f32 %v135_v29, %v127_v28 }
 0x349   :  { %565 = vtanh.f32 %v137_v30  ;;  %v178_v44 = vrot.slane %v137_v30, 6 }
 0x34f   :  { %v566_v31 = vpop.eup %565 }
 0x350   :  { %140 = vrot.lane.b32.xlu0 %v566_v31, %s617_s1 }
 0x3c2   :  { %v141_v32 = vpop.permute.xlu0 %140 }
 0x3c3   :  { %v143_v33 = vmul.f32 %v141_v32, %v121_v24 }
 0x3c5   :  { %v145_v34 = vrot.slane %v143_v33, 2 }
 0x3c7   :  { %146 = vrot.lane.b32.xlu1 %v145_v34, %s618_s3 }
 0x439   :  { %v147_v35 = vpop.permute.xlu1 %146 }
 0x43a   :  { %545 = vmatmul.msk.f32.vlgmr.msra.gmra.mxu2 %vm92_vm2, %v147_v35 }
 0x4bd   :  { %v167_v36 = vpop.f32.mrf.mxu2 }
 0x4be   :  { %v171_v37 = vrot.slane %v167_v36, 4 }
 0x4c0   :  { %v173_v38 = vadd.f32 %v171_v37, %v678_v4 }
 0x4c2   :  { %567 = vtanh.f32 %v173_v38 }
 0x4c8   :  { %v568_v39 = vpop.eup %567 }
 0x4c9   :  { %182 = vrot.lane.b32.xlu2 %v568_v39, %s617_s1  ;;  %v175_v40 = vmul.f32 0.5, %v568_v39 }
 0x4cb   :  { %v176_v41 = vadd.f32 0.5, %v175_v40 }
 0x4cd   :  { %v180_v45 = vmul.f32 %v178_v44, %v176_v41 }
 0x523   :  { %v183_v42 = vpop.permute.xlu2 %182 }
 0x524   :  { %v185_v43 = vmul.f32 %v183_v42, %v176_v41 }
 0x526   :  { %187 = vrot.lane.b32.xlu0 %v185_v43, %s617_s1 }
 0x598   :  { %v188_v46 = vpop.permute.xlu0 %187 }
 0x599   :  { %v190_v47 = vadd.f32 %v188_v46, %v180_v45 }
 0x59b   :  { %569 = vtanh.f32 %v190_v47  ;;  %v231_v61 = vrot.slane %v190_v47, 6 }
 0x5a1   :  { %v570_v48 = vpop.eup %569 }
 0x5a2   :  { %193 = vrot.lane.b32.xlu1 %v570_v48, %s617_s1 }
 0x614   :  { %v194_v49 = vpop.permute.xlu1 %193 }
 0x615   :  { %v196_v50 = vmul.f32 %v194_v49, %v176_v41 }
 0x617   :  { %v198_v51 = vrot.slane %v196_v50, 4 }
 0x619   :  { %199 = vrot.lane.b32.xlu2 %v198_v51, %s618_s3 }
 0x673   :  { %v200_v52 = vpop.permute.xlu2 %199 }
 0x674   :  { %546 = vmatmul.msk.f32.vlgmr.msra.gmra.mxu3 %vm92_vm2, %v200_v52 }
 0x6f7   :  { %v220_v53 = vpop.f32.mrf.mxu3 }
 0x6f8   :  { %v224_v54 = vrot.slane %v220_v53, 2 }
 0x6fa   :  { %v226_v55 = vadd.f32 %v224_v54, %v678_v4 }
 0x6fc   :  { %571 = vtanh.f32 %v226_v55 }
 0x702   :  { %v572_v56 = vpop.eup %571 }
 0x703   :  { %235 = vrot.lane.b32.xlu0 %v572_v56, %s617_s1  ;;  %v228_v57 = vmul.f32 0.5, %v572_v56 }
 0x705   :  { %v229_v58 = vadd.f32 0.5, %v228_v57 }
 0x707   :  { %v233_v62 = vmul.f32 %v231_v61, %v229_v58 }
 0x775   :  { %v236_v59 = vpop.permute.xlu0 %235 }
 0x776   :  { %v238_v60 = vmul.f32 %v236_v59, %v229_v58 }
 0x778   :  { %240 = vrot.lane.b32.xlu1 %v238_v60, %s617_s1 }
 0x7ea   :  { %v241_v63 = vpop.permute.xlu1 %240 }
 0x7eb   :  { %v243_v0 = vadd.f32 %v241_v63, %v233_v62 }
 0x7ed   :  { %573 = vtanh.f32 %v243_v0  ;;  %v281_v17 = vrot.slane %v243_v0, 6 }
 0x7f3   :  { %v574_v1 = vpop.eup %573 }
 0x7f4   :  { %246 = vrot.lane.b32.xlu2 %v574_v1, %s617_s1 }
 0x84e   :  { %v247_v4 = vpop.permute.xlu2 %246 }
 0x84f   :  { %v249_v5 = vmul.f32 %v247_v4, %v229_v58 }
 0x851   :  { %v251_v6 = vrot.slane %v249_v5, 6 }
 0x853   :  { %252 = vrot.lane.b32.xlu0 %v251_v6, %s618_s3 }
 0x8c5   :  { %v253_v7 = vpop.permute.xlu0 %252 }
 0x8c6   :  { %547 = vmatmul.msk.f32.vlgmr.msrb.gmra.mxu1 %vm92_vm2, %v253_v7 }
 0x943   :  { %v273_v10 = vpop.f32.mrf.mxu1 }
 0x944   :  { %v276_v11 = vadd.f32 %v273_v10, %v721_v9  ;;  %v459_v10 = vld [vmem:[%s778_s4 + $0x8] sm:$0xff] }
 0x946   :  { %575 = vtanh.f32 %v276_v11  ;;  %v458_v11 = vld [vmem:[%s778_s4] sm:$0xff] }
 0x94c   :  { %v576_v12 = vpop.eup %575 }
 0x94d   :  { %285 = vrot.lane.b32.xlu1 %v576_v12, %s617_s1  ;;  %v278_v13 = vmul.f32 0.5, %v576_v12 }
 0x94f   :  { %v279_v14 = vadd.f32 0.5, %v278_v13 }
 0x951   :  { %v283_v18 = vmul.f32 %v281_v17, %v279_v14  ;;  %v493_v17 = vld [vmem:[%s780_s6] sm:$0xff] }
 0x9bf   :  { %v286_v15 = vpop.permute.xlu1 %285 }
 0x9c0   :  { %v288_v16 = vmul.f32 %v286_v15, %v279_v14  ;;  %v494_v15 = vld [vmem:[%s780_s6 + $0x8] sm:$0xff]  ;;  %s532_s6 = sshll.u32 %s782_s8, 4  ;;  %s533_s6 = int_to_ptr.hbm [resolvable:$true] %s532_s6 }
 0x9c1   :  { %517 = vmatpush.msra.mxu2 %v494_v15 }
 0x9c2   :  { %290 = vrot.lane.b32.xlu2 %v288_v16, %s617_s1 }
 0x9c3   :  { %518 = vmatpush.msra.mxu2 %v493_v17 }
 0xa1c   :  { %v291_v19 = vpop.permute.xlu2 %290 }
 0xa1d   :  { %v293_v20 = vadd.f32 %v291_v19, %v283_v18  ;;  %v557_v18 = vld [vmem:[%s779_s5] ss:$0 sm:$0xff] }
 0xa1f   :  { %577 = vtanh.f32 %v293_v20  ;;  %v333_v32 = vrot.slane %v293_v20, 6 }
 0xa25   :  { %v578_v2 = vpop.eup %577 }
 0xa26   :  { %296 = vrot.lane.b32.xlu0 %v578_v2, %s617_s1 }
 0xa98   :  { %v297_v21 = vpop.permute.xlu0 %296 }
 0xa99   :  { %v299_v22 = vmul.f32 %v297_v21, %v279_v14  ;;  %v558_v21 = vld [vmem:[%s781_s7] ss:$0 sm:$0xff] }
 0xa9b   :  { %301 = vrot.lane.b32.xlu1 %v299_v22, %s618_s3 }
 0xb0d   :  { %v302_v23 = vpop.permute.xlu1 %301 }
 0xb0e   :  { %548 = vmatmul.msk.f32.vlgmr.msrb.gmra.mxu2 %vm92_vm2, %v302_v23 }
 0xb91   :  { %v322_v24 = vpop.f32.mrf.mxu2 }
 0xb92   :  { %v326_v25 = vrot.slane %v322_v24, 6 }
 0xb94   :  { %v328_v26 = vadd.f32 %v326_v25, %v721_v9 }
 0xb96   :  { %579 = vtanh.f32 %v328_v26 }
 0xb9c   :  { %v580_v27 = vpop.eup %579 }
 0xb9d   :  { %337 = vrot.lane.b32.xlu2 %v580_v27, %s617_s1  ;;  %v330_v28 = vmul.f32 0.5, %v580_v27 }
 0xb9f   :  { %v331_v29 = vadd.f32 0.5, %v330_v28 }
 0xba1   :  { %v335_v33 = vmul.f32 %v333_v32, %v331_v29 }
 0xbf7   :  { %v338_v30 = vpop.permute.xlu2 %337 }
 0xbf8   :  { %v340_v31 = vmul.f32 %v338_v30, %v331_v29 }
 0xbfa   :  { %342 = vrot.lane.b32.xlu0 %v340_v31, %s617_s1 }
 0xc6c   :  { %v343_v34 = vpop.permute.xlu0 %342 }
 0xc6d   :  { %v345_v35 = vadd.f32 %v343_v34, %v335_v33 }
 0xc6f   :  { %581 = vtanh.f32 %v345_v35  ;;  %v386_v49 = vrot.slane %v345_v35, 6 }
 0xc75   :  { %v582_v36 = vpop.eup %581 }
 0xc76   :  { %348 = vrot.lane.b32.xlu1 %v582_v36, %s617_s1 }
 0xce8   :  { %v349_v37 = vpop.permute.xlu1 %348 }
 0xce9   :  { %v351_v38 = vmul.f32 %v349_v37, %v331_v29 }
 0xceb   :  { %v353_v39 = vrot.slane %v351_v38, 2 }
 0xced   :  { %354 = vrot.lane.b32.xlu2 %v353_v39, %s618_s3 }
 0xd47   :  { %v355_v40 = vpop.permute.xlu2 %354 }
 0xd48   :  { %549 = vmatmul.msk.f32.vlgmr.msrb.gmra.mxu3 %vm92_vm2, %v355_v40 }
 0xdcb   :  { %v375_v41 = vpop.f32.mrf.mxu3 }
 0xdcc   :  { %v379_v42 = vrot.slane %v375_v41, 4 }
 0xdce   :  { %v381_v43 = vadd.f32 %v379_v42, %v721_v9 }
 0xdd0   :  { %583 = vtanh.f32 %v381_v43 }
 0xdd6   :  { %v584_v44 = vpop.eup %583 }
 0xdd7   :  { %390 = vrot.lane.b32.xlu0 %v584_v44, %s617_s1  ;;  %v383_v45 = vmul.f32 0.5, %v584_v44 }
 0xdd9   :  { %v384_v46 = vadd.f32 0.5, %v383_v45 }
 0xddb   :  { %v388_v50 = vmul.f32 %v386_v49, %v384_v46 }
 0xe49   :  { %v391_v47 = vpop.permute.xlu0 %390 }
 0xe4a   :  { %v393_v48 = vmul.f32 %v391_v47, %v384_v46 }
 0xe4c   :  { %395 = vrot.lane.b32.xlu1 %v393_v48, %s617_s1 }
 0xebe   :  { %v396_v51 = vpop.permute.xlu1 %395 }
 0xebf   :  { %v398_v52 = vadd.f32 %v396_v51, %v388_v50 }
 0xec1   :  { %585 = vtanh.f32 %v398_v52  ;;  %v439_v3 = vrot.slane %v398_v52, 6 }
 0xec7   :  { %v586_v53 = vpop.eup %585 }
 0xec8   :  { %401 = vrot.lane.b32.xlu2 %v586_v53, %s617_s1 }
 0xf22   :  { %v402_v54 = vpop.permute.xlu2 %401 }
 0xf23   :  { %v404_v55 = vmul.f32 %v402_v54, %v384_v46 }
 0xf25   :  { %v406_v56 = vrot.slane %v404_v55, 4 }
 0xf27   :  { %407 = vrot.lane.b32.xlu0 %v406_v56, %s618_s3 }
 0xf99   :  { %v408_v57 = vpop.permute.xlu0 %407 }
 0xf9a   :  { %550 = vmatmul.msk.f32.vlgmr.msrb.gmra.mxu0 %vm92_vm2, %v408_v57 }
0x1017   :  { %v428_v58 = vpop.f32.mrf.mxu0 }
0x1018   :  { %v432_v59 = vrot.slane %v428_v58, 2 }
0x101a   :  { %v434_v60 = vadd.f32 %v432_v59, %v721_v9  ;;  %v460_v9 = vld [vmem:[%s778_s4 + $0x10] sm:$0xff] }
0x101b   :  { %485 = vmatpush.msra.mxu1 %v460_v9 }
0x101c   :  { %587 = vtanh.f32 %v434_v60 }
0x101d   :  { %486 = vmatpush.msra.mxu1 %v459_v10 }
0x101f   :  { %487 = vmatpush.msra.mxu1 %v458_v11 }
0x1022   :  { %v588_v61 = vpop.eup %587 }
0x1023   :  { %443 = vrot.lane.b32.xlu1 %v588_v61, %s617_s1  ;;  %v436_v62 = vmul.f32 0.5, %v588_v61 }
0x1025   :  { %v437_v63 = vadd.f32 0.5, %v436_v62 }
0x1027   :  { %v441_v4 = vmul.f32 %v439_v3, %v437_v63 }
0x1095   :  { %v444_v0 = vpop.permute.xlu1 %443 }
0x1096   :  { %v446_v1 = vmul.f32 %v444_v0, %v437_v63 }
0x1098   :  { %448 = vrot.lane.b32.xlu2 %v446_v1, %s617_s1 }
0x10f2   :  { %v449_v5 = vpop.permute.xlu2 %448 }
0x10f3   :  { %v451_v6 = vadd.f32 %v449_v5, %v441_v4 }
0x10f5   :  { %589 = vtanh.f32 %v451_v6 }
0x10fb   :  { %v590_v7 = vpop.eup %589 }
0x10fc   :  { %454 = vrot.lane.b32.xlu0 %v590_v7, %s617_s1 }
0x116e   :  { %v455_v12 = vpop.permute.xlu0 %454 }
0x116f   :  { %v457_v13 = vmul.f32 %v455_v12, %v437_v63 }
0x1171   :  { %v467_v14 = vrot.slane %v457_v13, 6 }
0x1173   :  { %468 = vrot.lane.b32.xlu1 %v467_v14, %s618_s3  ;;  %s619_s3 = smov [#allocation2]  }
0x1174   :  { %s530_s11 = sshll.u32 %s619_s3, 4  ;;  %s531_s11 = int_to_ptr.vmem [resolvable:$true] %s530_s11 }
0x11e5   :  { %v469_v16 = vpop.permute.xlu1 %468 }
0x11e6   :  { %551 = vmatmul.msk.f32.vlgmr.msra.gmra.mxu1 %vm92_vm2, %v469_v16 }
0x1263   :  { %v489_v19 = vpop.f32.mrf.mxu1 }
0x1264   :  { %v490_v20 = vadd.f32 %v557_v18, %v489_v19 }
0x1266   :  { %v492_v2 = vmax.f32 %v490_v20, 0.0 }
0x1268   :  { %552 = vmatmul.msk.f32.vlgmr.msra.gmra.mxu2 %vm499_vm3, %v492_v2 }
0x12eb   :  { %v520_v22 = vpop.f32.mrf.mxu2 }
0x12ec   :  { %v521_v23 = vadd.f32 %v558_v21, %v520_v22 }
0x12ee   :  { %524 = vst.msk [vmem:[#allocation2] sm:$0x3] %vm523_vm4, %v521_v23 }
0x12ef   :  { %535 = dma.vmem_to_hbm [thread:$0]  %s531_s11, 32, %s533_s6, [#allocation3]  }
0x12f0   :  { %615 = dma.done.wait [#allocation3], 32  }
0x12f1   :  { %616 = vsyncadd [#allocation3], 4294967264 }
0x12f2   :  { %540 = vsyncpa [#allocation3], 1 }

</bundles_post_ra>
